<compile_context>
chip_gen: v5e
topology: v5e:2x2
jax: 0.10.0
libtpu: 0.0.40
codegen_flags: <defaults>
</compile_context>

<pallas_src>
import functools

import jax
import jax.numpy as jnp
from jax import lax
from jax.experimental import pallas as pl
from jax.experimental.pallas import tpu as pltpu

_LANE = 128
_STREAM_BUDGET_BYTES = 16 * 1024 * 1024  # VMEM budget for double-buffered feature tiles


# ---------------------------------------------------------------------------
# Tiling helpers
# ---------------------------------------------------------------------------
def _pick_tile_k(m, k_dim, tile_k=None):
    """Pick a K tile (multiple of 128, or the full K) and the padded K extent."""
    if tile_k is None:
        cap = (_STREAM_BUDGET_BYTES // (2 * m * 4)) // _LANE * _LANE
        tile_k = max(_LANE, min(8192, cap))
    else:
        tile_k = max(_LANE, (tile_k // _LANE) * _LANE)
    if k_dim <= tile_k:
        return k_dim, k_dim                      # single block == full dim (always legal)
    k_padded = ((k_dim + tile_k - 1) // tile_k) * tile_k
    return tile_k, k_padded


def _prepare_features(x, tile_k, stream_dtype):
    n, c, h, w = x.shape
    m, k = n * c, h * w
    feats = x.reshape(m, k)
    if stream_dtype is not None:
        feats = feats.astype(stream_dtype)       # e.g. bf16 halves HBM traffic (opt-in)
    tk, k_padded = _pick_tile_k(m, k, tile_k)
    if k_padded != k:
        # zero columns contribute nothing to features @ features.T
        feats = jnp.pad(feats, ((0, 0), (0, k_padded - k)))
    return feats, m, k, tk, k_padded


def _compiler_params(m, tk, itemsize, n_resident_mm):
    streamed = 2 * m * tk * itemsize             # double-buffered feature tiles
    resident = n_resident_mm * m * m * 4         # Gram accumulator / target / output
    limit = max(32 * 1024 * 1024, streamed + resident + (4 << 20))
    return pltpu.CompilerParams(
        dimension_semantics=("arbitrary",),      # K axis is a reduction
        vmem_limit_bytes=limit,
    )


# ---------------------------------------------------------------------------
# Kernels
# ---------------------------------------------------------------------------
def _gram_kernel(feat_ref, gram_ref, *, scale):
    """Accumulate Gram over K tiles in the resident output; scale on last step."""
    kk = pl.program_id(0)

    @pl.when(kk == 0)
    def _():
        gram_ref[...] = jnp.zeros_like(gram_ref)

    f = feat_ref[...].astype(jnp.float32)
    # features @ features.T, contracting on K of both operands (no transpose copy).
    gram_ref[...] += lax.dot_general(
        f, f,
        dimension_numbers=(((1,), (1,)), ((), ())),
        preferred_element_type=jnp.float32,
    )

    @pl.when(kk == pl.num_programs(0) - 1)
    def _():
        gram_ref[...] = gram_ref[...] * scale


def _style_loss_kernel(feat_ref, target_ref, loss_ref, gram_acc, *, scale, mse_scale):
    """Fused Gram accumulation + MSE(Gram, target); Gram lives only in VMEM scratch."""
    kk = pl.program_id(0)

    @pl.when(kk == 0)
    def _():
        gram_acc[...] = jnp.zeros_like(gram_acc)

    f = feat_ref[...].astype(jnp.float32)
    gram_acc[...] += lax.dot_general(
        f, f,
        dimension_numbers=(((1,), (1,)), ((), ())),
        preferred_element_type=jnp.float32,
    )

    @pl.when(kk == pl.num_programs(0) - 1)
    def _():
        diff = gram_acc[...] * scale - target_ref[...].astype(jnp.float32)
        # NOTE: kept as a (1, 1) VMEM store (reviewer's accepted fallback) rather
        # than an SMEM scalar, avoiding a vector->scalar store lowering path.
        loss_ref[...] = jnp.sum(diff * diff, axis=(0, 1), keepdims=True) * mse_scale


# ---------------------------------------------------------------------------
# Wrappers
# ---------------------------------------------------------------------------
def gram_matrix(x, *, tile_k=None, stream_dtype=None):
    """x: (N, C, H, W) -> Gram matrix (N*C, N*C) / (N*C*H*W), float32."""
    feats, m, k, tk, k_padded = _prepare_features(x, tile_k, stream_dtype)
    grid = (k_padded // tk,)
    return pl.pallas_call(
        functools.partial(_gram_kernel, scale=1.0 / float(m * k)),
        out_shape=jax.ShapeDtypeStruct((m, m), jnp.float32),
        grid=grid,
        in_specs=[pl.BlockSpec((m, tk), lambda kk: (0, kk))],   # streamed K tiles
        out_specs=pl.BlockSpec((m, m), lambda kk: (0, 0)),      # resident accumulator
        compiler_params=_compiler_params(m, tk, feats.dtype.itemsize, 2),
    )(feats)


def style_loss_forward(x, target_gram, *, tile_k=None, stream_dtype=None):
    """Returns (x, loss) where loss = MSE(gram_matrix(x), target_gram)."""
    feats, m, k, tk, k_padded = _prepare_features(x, tile_k, stream_dtype)
    grid = (k_padded // tk,)
    loss = pl.pallas_call(
        functools.partial(
            _style_loss_kernel,
            scale=1.0 / float(m * k),
            mse_scale=1.0 / float(m * m),
        ),
        out_shape=jax.ShapeDtypeStruct((1, 1), jnp.float32),
        grid=grid,
        in_specs=[
            pl.BlockSpec((m, tk), lambda kk: (0, kk)),          # streamed K tiles
            pl.BlockSpec((m, m), lambda kk: (0, 0)),            # target Gram, resident
        ],
        out_specs=pl.BlockSpec((1, 1), lambda kk: (0, 0)),
        scratch_shapes=[pltpu.VMEM((m, m), jnp.float32)],       # Gram acc (never hits HBM)
        compiler_params=_compiler_params(m, tk, feats.dtype.itemsize, 3),
    )(feats, target_gram)
    return x, loss[0, 0]


class StyleLoss:
    """Mirror of the PyTorch StyleLoss module (stateless JAX version)."""

    def __init__(self, target_feature, *, tile_k=None, stream_dtype=None):
        self._tile_k = tile_k
        self._stream_dtype = stream_dtype
        # target Gram is "detached" — it is just a constant array here.
        self.target = gram_matrix(target_feature, tile_k=tile_k,
                                  stream_dtype=stream_dtype)
        self.loss = None

    def __call__(self, x):
        out, loss = style_loss_forward(x, self.target, tile_k=self._tile_k,
                                       stream_dtype=self._stream_dtype)
        self.loss = loss
        return out


# ---------------------------------------------------------------------------
# Main
# ---------------------------------------------------------------------------
if __name__ == "__main__":
    key = jax.random.PRNGKey(0)
    k1, k2 = jax.random.split(key)

    # small NCHW feature maps; tile_k=128 forces a 2-step K grid so the
    # accumulate/epilogue pipeline path is exercised even at toy sizes.
    N, C, H, W = 2, 4, 16, 16
    target_feature = jax.random.normal(k1, (N, C, H, W), dtype=jnp.float32)
    x = jax.random.normal(k2, (N, C, H, W), dtype=jnp.float32)

    module = StyleLoss(target_feature, tile_k=128)
    out = module(x)
    out = jax.block_until_ready(out)
    loss = jax.block_until_ready(module.loss)

    # pure-JAX reference check
    def gram_ref_fn(v):
        a, b, c, d = v.shape
        f = v.reshape(a * b, c * d).astype(jnp.float32)
        return (f @ f.T) / (a * b * c * d)

    ref_loss = jnp.mean((gram_ref_fn(x) - gram_ref_fn(target_feature)) ** 2)
    assert out.shape == x.shape
    assert jnp.allclose(out, x)
    assert jnp.allclose(module.target, gram_ref_fn(target_feature),
                        rtol=1e-5, atol=1e-5)
    assert jnp.allclose(loss, ref_loss, rtol=1e-5, atol=1e-5), (loss, ref_loss)

    print("KERNEL_OK")
</pallas_src>

<mosaic_0001>
module attributes {stable_mosaic.version = 11 : i64} {
  func.func @_gram_kernel(%arg0: i32, %arg1: memref<8x128xf32, #tpu.memory_space<vmem>>, %arg2: memref<8x8xf32, #tpu.memory_space<vmem>>) attributes {dimension_semantics = [#tpu.dimension_semantics<arbitrary>], iteration_bounds = array<i64: 2>, scalar_prefetch = 0 : i64, scratch_operands = 0 : i64, tpu.core_type = #tpu.core_type<tc>, window_params = [{transform_indices = @transform_0, window_bounds = array<i64: 8, 128>}, {pipeline_mode = #tpu.pipeline_mode<synchronous>, transform_indices = @transform_1, window_bounds = array<i64: 8, 8>}]} {
    %c0_i32 = arith.constant 0 : i32
    %0 = arith.cmpi eq, %arg0, %c0_i32 : i32
    %1 = arith.extui %0 : i1 to i32
    %c0_i32_0 = arith.constant 0 : i32
    %2 = arith.cmpi ne, %1, %c0_i32_0 : i32
    scf.if %2 {
      %cst_7 = arith.constant 0.000000e+00 : f32
      %11 = vector.broadcast %cst_7 : f32 to vector<8x8xf32>
      %c0_8 = arith.constant 0 : index
      %c0_9 = arith.constant 0 : index
      %12 = vector.load %arg2[%c0_8, %c0_9] : memref<8x8xf32, #tpu.memory_space<vmem>>, vector<8x8xf32>
      tpu.vector_store %arg2[%c0_8, %c0_9], %11 {strides = array<i32>} : memref<8x8xf32, #tpu.memory_space<vmem>>, vector<8x8xf32>,
    } else {
    }
    %c0 = arith.constant 0 : index
    %c0_1 = arith.constant 0 : index
    %3 = vector.load %arg1[%c0, %c0_1] : memref<8x128xf32, #tpu.memory_space<vmem>>, vector<8x128xf32>
    %c0_2 = arith.constant 0 : index
    %c0_3 = arith.constant 0 : index
    %4 = vector.load %arg2[%c0_2, %c0_3] : memref<8x8xf32, #tpu.memory_space<vmem>>, vector<8x8xf32>
    %cst = arith.constant dense<0.000000e+00> : vector<8x8xf32>
    %5 = tpu.matmul %3, %3, %cst {dimension_numbers = #tpu.dot_dimension_numbers<[1], [1], [0], [0], [0, 0, 1, 0], [], []>} : vector<8x128xf32>, vector<8x128xf32>, vector<8x8xf32> -> vector<8x8xf32>
    %6 = arith.addf %4, %5 : vector<8x8xf32>
    %c0_4 = arith.constant 0 : index
    %c0_5 = arith.constant 0 : index
    %7 = vector.load %arg2[%c0_4, %c0_5] : memref<8x8xf32, #tpu.memory_space<vmem>>, vector<8x8xf32>
    tpu.vector_store %arg2[%c0_4, %c0_5], %6 {strides = array<i32>} : memref<8x8xf32, #tpu.memory_space<vmem>>, vector<8x8xf32>,
    %c1_i32 = arith.constant 1 : i32
    %8 = arith.cmpi eq, %arg0, %c1_i32 : i32
    %9 = arith.extui %8 : i1 to i32
    %c0_i32_6 = arith.constant 0 : i32
    %10 = arith.cmpi ne, %9, %c0_i32_6 : i32
    scf.if %10 {
      %c0_7 = arith.constant 0 : index
      %c0_8 = arith.constant 0 : index
      %11 = vector.load %arg2[%c0_7, %c0_8] : memref<8x8xf32, #tpu.memory_space<vmem>>, vector<8x8xf32>
      %cst_9 = arith.constant 4.8828125E-4 : f32
      %12 = vector.broadcast %cst_9 : f32 to vector<8x8xf32>
      %13 = arith.mulf %11, %12 : vector<8x8xf32>
      %c0_10 = arith.constant 0 : index
      %c0_11 = arith.constant 0 : index
      %14 = vector.load %arg2[%c0_10, %c0_11] : memref<8x8xf32, #tpu.memory_space<vmem>>, vector<8x8xf32>
      tpu.vector_store %arg2[%c0_10, %c0_11], %13 {strides = array<i32>} : memref<8x8xf32, #tpu.memory_space<vmem>>, vector<8x8xf32>,
    } else {
    }
    return
  }
  func.func @transform_0(%arg0: i32) -> (i32, i32) {
    %c0_i32 = arith.constant 0 : i32
    %c0_i32_0 = arith.constant 0 : i32
    return %c0_i32, %arg0 : i32, i32
  }
  func.func @transform_1(%arg0: i32) -> (i32, i32) {
    %c0_i32 = arith.constant 0 : i32
    %c0_i32_0 = arith.constant 0 : i32
    %c0_i32_1 = arith.constant 0 : i32
    return %c0_i32, %c0_i32_0 : i32, i32
  }
}

</mosaic_0001>

<bundles_post_ra>
// kernel: tpu_custom_call.1
= control target key start
LH: loop header
LB: loop body
LE: loop exit
PB: predicated region body
PF: predicated region fallthrough
CT: control target
= control target key end

     0   :  { %6 = vsyncpa [#allocation3], 0  ;;  %s484_s0 = inlined_call_operand.hbm [shape: f32[8,256], index: 0, kind: input, shape index: {}]   ;;  %s485_s1 = inlined_call_operand.hbm [shape: f32[8,8], index: 1, kind: output, shape index: {}]  }
   0x1   :  { %8 = vsyncpa [#allocation3 + $0x1], 0 }
   0x2   :  { %9 = vsyncpa [#allocation4], 0  ;;  %s389_s6 = smov 0   ;;  %s391_s7 = smov 0  }
   0x3   :  { %s393_s8 = smov 0   ;;  %s395_s9 = smov 0  }
   0x4 LB: > { %s408_s10 = sadd.s32 4294967295, %s375_s9   ;;  %s411_s11 = sadd.s32 1, %s375_s9   ;;  %s375_s9 = sphi %s395_s9, %s492_s9   ;;  %s371_s8 = sphi %s393_s8, %s491_s8   ;;  %s367_s7 = sphi %s391_s7, %s490_s7   ;;  %s363_s6 = sphi %s389_s6, %s489_s6  }
   0x5   : > { %s19_s12 = ssub.s32 %s375_s9, %s411_s11  ;;  %s22_s13 = sadd.s32 1, %s371_s8 }
   0x6   : > { %p20_p0 = scmp.eq.s32.totalorder %s19_s12, 0  ;;  %p29_p1 = scmp.ne.s32.totalorder %s371_s8, %s367_s7 }
   0x7   : > { %p30_p2 = scmp.eq.s32.totalorder %s375_s9, 0  ;;  %p35_p3 = scmp.ne.s32.totalorder %s367_s7, %s363_s6 }
   0x8   : > { %s421_s14 = scalar_select %p20_p0, %s371_s8, %s22_s13  }
   0x9   : > { %p423_p4 = por %p30_p2, %p29_p1  ;;  %p36_p5 = scmp.eq.s32.totalorder %s408_s10, 0 }
   0xa   : > { %p242_p6 = scmp.lt.s32.totalorder %s375_s9, 2  ;;  %s80_s17 = sand.u32 1, %s371_s8  }
   0xb   : > { %p429_p7 = por %p36_p5, %p35_p3  ;;  %s222_s18 = sshll.u32 %s80_s17, 3 }
   0xc   : > { %s223_s19 = sshll.u32 %s375_s9, 3  ;;  %s84_s23 = scalar_lea.vmem [#allocation2], %s222_s18 }
   0xd   : > { %s88_s22 = scalar_lea.hbm %s484_s0, %s223_s19  ;;  %s92_s24 = sshll.u32 %s84_s23, 4  ;;  %s93_s24 = int_to_ptr.vmem [resolvable:$true] %s92_s24 }
   0xe   : > { %s90_s25 = sshll.u32 %s88_s22, 4  ;;  %p440_p8 = pnand %p242_p6, %p423_p4  ;;  %s91_s25 = int_to_ptr.hbm [resolvable:$true] %s90_s25 }
   0xf   : > { %p224_p9 = scmp.ge.s32.totalorder %s375_s9, 1  ;;  %p97_p10 = scmp.lt.s32.totalorder %s375_s9, 3 }
  0x10   : > { %s81_s27 = scalar_lea.sflag [#allocation3], %s80_s17  ;;  %s279_s28 = sshra.s32 %s91_s25, 4  ;;  %s280_s28 = int_to_ptr.hbm [resolvable:$true] %s279_s28 }
  0x11   : > { %s281_s29 = scalar_lea.hbm %s280_s28, 8  ;;  %p283_p12 = pneg %p440_p8 }
  0x12   : > { %p282_p11 = scmp.ne.s32.totalorder %s280_s28, %s281_s29  ;;  %s286_s3 = scalar_lea.hbm %s484_s0, 16 }
  0x13   : > { %p287_p1 = scmp.lt.s32.totalorder %s280_s28, %s484_s0  ;;  %p288_p2 = scmp.lt.s32.totalorder %s286_s3, %s281_s29 }
  0x14   : > { %p284_p13 = pnand %p283_p12, %p282_p11 }
  0x15   : > { %p289_p3 = por %p288_p2, %p287_p1 }
  0x16   : > { %p285_p0 = pneg %p284_p13 }
  0x18   : > { %p290_p4 = pnand %p289_p3, %p285_p0 }
  0x1a   : > { %293 = shalt.err (!%p290_p4)
}
  0x1b   : > { %241 = dma.hbm_to_vmem [thread:$0]  (!%p440_p8), %s91_s25, 128, %s93_s24, %s81_s27  }
  0x1c   : > { %p98_p5 = pnand %p224_p9, %p97_p10 }
  0x1d   : > { %s103_s6 = sand.u32 (!%p98_p5), 1, %s367_s7  }
  0x1e   : > { %101 = sbr.rel (%p98_p5) target bundleno = 193 (0xc1), region = 24  ;;  %s225_s12 = sshll.u32 (!%p98_p5), %s103_s6, 3 }
  0x1f   : > { %s104_s13 = scalar_lea.sflag (!%p98_p5), [#allocation3], %s103_s6  ;;  %s107_s15 = scalar_lea.vmem (!%p98_p5), [#allocation2], %s225_s12 }
  0x23   : > { %354 = dma.done.wait (%p429_p7), %s104_s13, 128  }
  0x24   : > { %356 = vsyncadd (%p429_p7), %s104_s13, 4294967168  ;;  %p226_p6 = scmp.ne.s32.totalorder %s408_s10, 0 }
  0x26   : > { %125 = sbr.rel (%p226_p6) target bundleno = 45 (0x2d), region = 32 }
  0x2b   : > { %vm126_vm0 = vcmask 64512   ;;  %v377_v0 = vmov 0.0  }
  0x2c   : > { %127 = vst.msk [vmem:[#allocation5] sm:$0xff] %vm126_vm0, %v377_v0 }
  0x2d PF: > { %v128_v1 = vld [vmem:[%s107_s15] sm:$0xff]  ;;  %vm151_vm1 = vcmask 64512   ;;  %p227_p8 = scmp.ne.s32.totalorder %s408_s10, 1 }
  0x2e   : > { %145 = vmatpush.xpose.msra.mxu0 %v128_v1 }
  0x31   : > { %146 = vmatmul.f32.vlgmr.msra.gmra.mxu0 %v128_v1 }
  0x33   : > { %v129_v2 = vld [vmem:[#allocation5] sm:$0xff] }
  0xad   : > { %156 = sbr.rel (%p227_p8) target bundleno = 188 (0xbc), region = 36 }
  0xae   : > { %v147_v3 = vpop.f32.mrf.mxu0 }
  0xaf   : > { %v150_v4 = vadd.f32 %v147_v3, %v129_v2 }
  0xb1   : > { %152 = vst.msk [vmem:[#allocation5] sm:$0xff] %vm151_vm1, %v150_v4 }
  0xb8   : > { %v157_v5 = vld [vmem:[#allocation5] sm:$0xff] }
  0xb9   : > { %v158_v6 = vmul.f32 0.00048828125, %v157_v5 }
  0xbb   : > { %159 = vst.msk [vmem:[#allocation5] sm:$0xff] %vm151_vm1, %v158_v6 }
  0xbc PF: > { %p243_p7 = scmp.eq.s32.totalorder %s408_s10, 1  ;;  %s378_s9 = smov [#allocation5]  }
  0xbd   : > { %s166_s16 = sshll.u32 %s378_s9, 4  ;;  %s168_s19 = sshll.u32 %s485_s1, 4  ;;  %s167_s16 = int_to_ptr.vmem [resolvable:$true] %s166_s16  ;;  %s169_s19 = int_to_ptr.hbm [resolvable:$true] %s168_s19 }
  0xbe   : > { %235 = dma.vmem_to_hbm [thread:$0]  (%p243_p7), %s167_s16, 128, %s169_s19, [#allocation4]  }
  0xbf   : > { %358 = dma.done.wait (%p243_p7), [#allocation4], 128  }
  0xc0   : > { %360 = vsyncadd (%p243_p7), [#allocation4], 4294967168 }
  0xc1 PF: > { %p12_p9 = scmp.ge.s32.totalorder %s411_s11, 4   ;;  %s489_s6 = smov %s367_s7 }
  0xc2   : > { %s490_s7 = smov %s371_s8  ;;  %s491_s8 = smov %s421_s14 }
  0xc3   : > { %s492_s9 = smov %s411_s11  ;;  %14 = sbr.rel (!%p12_p9) target bundleno = 4 (0x4), region = 69 }
  0xc8   :  { %182 = vsyncpa [#allocation3], 1 }
  0xc9   :  { %184 = vsyncpa [#allocation3 + $0x1], 1 }
  0xca   :  { %185 = vsyncpa [#allocation4], 1 }
  0xcb   :  { %187 = vsyncpa [#allocation4 + $0x1], 1 }

</bundles_post_ra>
